<compile_context>
chip_gen: v5e
topology: v5e:2x2
jax: 0.10.0
libtpu: 0.0.40
codegen_flags: <defaults>
</compile_context>

<pallas_src>
import jax
import jax.numpy as jnp
from jax.experimental import pallas as pl
from jax.experimental.pallas import tpu as pltpu


def _fused_linear_kernel(x_ref, p_ref, y_ref):
    # p_ref rows: [0:F] = fused weight W (already oriented for x @ W),
    #             [F]   = fused bias b.
    rows = p_ref.shape[0]
    x = x_ref[...].astype(jnp.float32)            # (B, F)
    w = p_ref[: rows - 1, :].astype(jnp.float32)  # (F, F)
    b = p_ref[rows - 1:, :].astype(jnp.float32)   # (1, F)

    y = jnp.dot(x, w, preferred_element_type=jnp.float32) + b
    y_ref[...] = y.astype(y_ref.dtype)


def mlp_stack(x, w1, b1, w2, b2):
    """Equivalent of: stack([fc2(layers(x)), fc2(layers(x))], dim=1)."""
    B, F = x.shape

    # Fold the two PyTorch linears (y = x @ W.T + b) into one affine map.
    # y = (x @ w1.T + b1) @ w2.T + b2 = x @ (w1.T @ w2.T) + (b1 @ w2.T + b2)
    W = (w1.T @ w2.T).astype(jnp.float32)                 # (F, F)
    b = (b1 @ w2.T + b2).astype(jnp.float32)              # (F,)
    params = jnp.concatenate([W, b.reshape(1, F)], axis=0)  # (F+1, F)

    y = pl.pallas_call(
        _fused_linear_kernel,
        out_shape=jax.ShapeDtypeStruct((B, F), x.dtype),
        in_specs=[
            pl.BlockSpec(memory_space=pltpu.MemorySpace.VMEM),
            pl.BlockSpec(memory_space=pltpu.MemorySpace.VMEM),
        ],
        out_specs=pl.BlockSpec(memory_space=pltpu.MemorySpace.VMEM),
        cost_estimate=pl.CostEstimate(
            flops=2 * B * F * F + B * F,
            transcendentals=0,
            bytes_accessed=4 * (B * F + (F + 1) * F + B * F),
        ),
    )(x, params)

    # torch.stack([y, y], dim=1) -> (B, 2, F); pure layout, done outside kernel.
    return jnp.broadcast_to(y[:, None, :], (B, 2, F))


if __name__ == "__main__":
    key = jax.random.PRNGKey(0)
    kx, k1, k2, k3, k4 = jax.random.split(key, 5)

    B, F = 2, 2
    x = jax.random.normal(kx, (B, F), dtype=jnp.float32)

    # Deterministic parameter init (same shapes as nn.Linear(2, 2), (out, in)):
    bound = 1.0 / jnp.sqrt(jnp.float32(F))
    w1 = jax.random.uniform(k1, (F, F), minval=-bound, maxval=bound, dtype=jnp.float32)
    b1 = jax.random.uniform(k2, (F,),   minval=-bound, maxval=bound, dtype=jnp.float32)
    w2 = jax.random.uniform(k3, (F, F), minval=-bound, maxval=bound, dtype=jnp.float32)
    b2 = jax.random.uniform(k4, (F,),   minval=-bound, maxval=bound, dtype=jnp.float32)

    out = mlp_stack(x, w1, b1, w2, b2)
    out = jax.block_until_ready(out)

    # Pure-JAX reference (PyTorch Linear semantics: y = x @ W.T + b)
    y_ref = (x @ w1.T + b1) @ w2.T + b2
    ref = jnp.stack([y_ref, y_ref], axis=1)
    assert out.shape == (B, 2, F), out.shape
    assert jnp.allclose(out, ref, atol=1e-5, rtol=1e-5), (out, ref)

    print("KERNEL_OK")
</pallas_src>

<mosaic_0001>
module attributes {stable_mosaic.version = 11 : i64} {
  func.func @_fused_linear_kernel(%arg0: memref<2x2xf32, #tpu.memory_space<vmem>>, %arg1: memref<3x2xf32, #tpu.memory_space<vmem>>, %arg2: memref<2x2xf32, #tpu.memory_space<vmem>>) attributes {dimension_semantics = [], scalar_prefetch = 0 : i64, scratch_operands = 0 : i64, tpu.core_type = #tpu.core_type<tc>} {
    %c0 = arith.constant 0 : index
    %c0_0 = arith.constant 0 : index
    %0 = vector.load %arg0[%c0, %c0_0] : memref<2x2xf32, #tpu.memory_space<vmem>>, vector<2x2xf32>
    %c0_1 = arith.constant 0 : index
    %c0_2 = arith.constant 0 : index
    %1 = vector.load %arg1[%c0_1, %c0_2] : memref<3x2xf32, #tpu.memory_space<vmem>>, vector<2x2xf32>
    %c2 = arith.constant 2 : index
    %c0_3 = arith.constant 0 : index
    %2 = vector.load %arg1[%c2, %c0_3] : memref<3x2xf32, #tpu.memory_space<vmem>>, vector<1x2xf32>
    %cst = arith.constant dense<0.000000e+00> : vector<2x2xf32>
    %3 = tpu.matmul %0, %1, %cst {dimension_numbers = #tpu.dot_dimension_numbers<[1], [0], [0], [1], [0, 0, 1, 1], [], []>} : vector<2x2xf32>, vector<2x2xf32>, vector<2x2xf32> -> vector<2x2xf32>
    %4 = vector.broadcast %2 : vector<1x2xf32> to vector<2x2xf32>
    %5 = arith.addf %3, %4 : vector<2x2xf32>
    %c0_4 = arith.constant 0 : index
    %c0_5 = arith.constant 0 : index
    %6 = vector.load %arg2[%c0_4, %c0_5] : memref<2x2xf32, #tpu.memory_space<vmem>>, vector<2x2xf32>
    tpu.vector_store %arg2[%c0_4, %c0_5], %5 {strides = array<i32>} : memref<2x2xf32, #tpu.memory_space<vmem>>, vector<2x2xf32>,
    return
  }
}

</mosaic_0001>

<bundles_post_ra>
// kernel: tpu_custom_call.1
= control target key start
LH: loop header
LB: loop body
LE: loop exit
PB: predicated region body
PF: predicated region fallthrough
CT: control target
= control target key end

     0   :  { %vm20_vm0 = vcmask 1041408   ;;  %vm16_vm1 = vcmask 15360   ;;  %s120_s0 = inlined_call_operand.vmem [shape: f32[2,2], index: 0, kind: input, shape index: {}]   ;;  %s121_s1 = inlined_call_operand.vmem [shape: f32[3,2], index: 1, kind: input, shape index: {}]   ;;  %s122_s2 = inlined_call_operand.hbm [shape: f32[2,2], index: 2, kind: output, shape index: {}]  }
   0x1   :  { %v13_v0 = vld [vmem:[%s121_s1] sm:$0x3] }
   0x2   :  { %v12_v1 = vld [vmem:[%s120_s0] sm:$0x3]  ;;  %62 = vmatpush.msk.msra.mxu0 %vm20_vm0, %v13_v0 }
   0x3   :  { %7 = vsyncpa [#allocation3], 0  ;;  %63 = vmatmul.msk.f32.vlgmr.msra.gmra.mxu0 %vm16_vm1, %v12_v1  ;;  %v65_v2 = vld [vmem:[%s121_s1 + $0x2] ss:$0 sm:$0xff]  ;;  %s92_s15 = smov [#allocation2]   ;;  %s53_s19 = sshll.u32 %s122_s2, 4  ;;  %s54_s19 = int_to_ptr.hbm [resolvable:$true] %s53_s19 }
   0x4   :  { %s51_s16 = sshll.u32 %s92_s15, 4  ;;  %vm44_vm2 = vcmask 9216   ;;  %s52_s16 = int_to_ptr.vmem [resolvable:$true] %s51_s16 }
  0x80   :  { %v41_v3 = vpop.f32.mrf.mxu0 }
  0x81   :  { %v42_v4 = vadd.f32 %v65_v2, %v41_v3 }
  0x83   :  { %45 = vst.msk [vmem:[#allocation2] sm:$0x3] %vm44_vm2, %v42_v4 }
  0x84   :  { %56 = dma.vmem_to_hbm [thread:$0]  %s52_s16, 32, %s54_s19, [#allocation3]  }
  0x85   :  { %90 = dma.done.wait [#allocation3], 32  }
  0x86   :  { %91 = vsyncadd [#allocation3], 4294967264 }
  0x87   :  { %61 = vsyncpa [#allocation3], 1 }

</bundles_post_ra>
